<compile_context>
chip_gen: v6e
topology: v6e:2x2x1
jax: 0.10.0
libtpu: 0.0.40
codegen_flags: <defaults>
</compile_context>

<pallas_src>
import functools
import math

import jax
import jax.numpy as jnp
from jax.experimental import pallas as pl
from jax.experimental.pallas import tpu as pltpu

RANK_PAD = 128   # pad LoRA rank to a lane-friendly width


def _round_up(x: int, m: int) -> int:
    return (x + m - 1) // m * m


def _hw_vmem_bytes():
    try:
        info = pltpu.get_tpu_info()
        return int(getattr(info, "vmem_capacity_bytes", 0)) or None
    except Exception:
        return None


def _default_tiles():
    """Per-generation tile defaults.

    512x512 output tiles clear the HBM/MXU roofline on v5e (~240 FLOP/B) and
    v7x (~310 FLOP/B); on 128-MiB-VMEM parts (v5e/v6e) a deeper TK=1024 is
    used (v6e could go to 1024x1024 tiles — left at 512 for a safe default).
    """
    tm, tn, tk = 512, 512, 512
    vmem = _hw_vmem_bytes()
    if vmem is not None and vmem >= 100 * 1024 * 1024:
        tk = 1024
    return tm, tn, tk


def _tile_and_pad(dim: int, pref: int, align: int):
    """Return (tile_size, padded_dim) for one dimension."""
    if dim <= pref:
        pad = _round_up(dim, align)
        return pad, pad
    pad = _round_up(dim, pref)
    return pref, pad


def _lora_linear_kernel(alpha_ref, x_ref, wt_ref, xa_ref, bt_ref, o_ref,
                        acc_ref):
    k = pl.program_id(2)

    @pl.when(k == 0)
    def _():
        acc_ref[...] = jnp.zeros_like(acc_ref)

    # Frozen path: accumulate x_tile @ W_t_tile on the MXU in f32.
    acc_ref[...] += jnp.dot(x_ref[...], wt_ref[...],
                            preferred_element_type=jnp.float32)   # (tm, tn)

    @pl.when(k == pl.num_programs(2) - 1)
    def _():
        # Up-project the precomputed rank-sized intermediate, scale by alpha
        # (runtime SMEM scalar), add into the frozen accumulator, store once.
        alpha = alpha_ref[0]
        xa = (alpha * xa_ref[...]).astype(bt_ref.dtype)           # (tm, r_pad)
        lora = jnp.dot(xa, bt_ref[...],
                       preferred_element_type=jnp.float32)        # (tm, tn)
        o_ref[...] = (acc_ref[...] + lora).astype(o_ref.dtype)


def prepare_lora_weights(w, a, b, *, tn=None, tk=None, rank_pad=RANK_PAD,
                         compute_dtype=jnp.bfloat16):
    """One-time weight prep (do NOT call per forward pass).

    w: (out_dim, in_dim)  -> W_t (K_pad, N_pad)   [compute_dtype]
    a: (rank, in_dim)     -> A_t (K_pad, R_pad)   [compute_dtype]
    b: (out_dim, rank)    -> B_t (R_pad, N_pad)   [compute_dtype]
    All padded regions are zero, which is exact for the dot products.
    """
    dtm, dtn, dtk = _default_tiles()
    tn = tn or dtn
    tk = tk or dtk

    out_dim, in_dim = w.shape
    rank = a.shape[0]
    assert a.shape == (rank, in_dim) and b.shape == (out_dim, rank)

    _, k_pad = _tile_and_pad(in_dim, tk, 128)
    _, n_pad = _tile_and_pad(out_dim, tn, 128)
    r_pad = _round_up(rank, rank_pad)

    w_t = jnp.zeros((k_pad, n_pad), compute_dtype).at[:in_dim, :out_dim].set(
        w.T.astype(compute_dtype))
    a_t = jnp.zeros((k_pad, r_pad), compute_dtype).at[:in_dim, :rank].set(
        a.T.astype(compute_dtype))
    b_t = jnp.zeros((r_pad, n_pad), compute_dtype).at[:rank, :out_dim].set(
        b.T.astype(compute_dtype))
    return w_t, a_t, b_t


def lora_linear(x, w_t, a_t, b_t, alpha, out_dim, *, tm=None, tn=None, tk=None):
    """x: (..., in_dim); w_t/a_t/b_t produced once by prepare_lora_weights()."""
    dtm, dtn, dtk = _default_tiles()
    tm = tm or dtm
    tn = tn or dtn
    tk = tk or dtk

    in_dim = x.shape[-1]
    lead = x.shape[:-1]
    m = math.prod(lead)

    k_pad, n_pad = w_t.shape
    r_pad = a_t.shape[1]
    assert k_pad >= in_dim and n_pad >= out_dim
    compute_dtype = w_t.dtype

    m_align = 16 if compute_dtype == jnp.bfloat16 else 8
    tm_eff, m_pad = _tile_and_pad(m, tm, m_align)
    tk_eff = tk if k_pad > tk else k_pad
    tn_eff = tn if n_pad > tn else n_pad
    assert k_pad % tk_eff == 0 and n_pad % tn_eff == 0

    x2 = x.reshape(m, in_dim).astype(compute_dtype)
    if m_pad != m or k_pad != in_dim:
        # TODO(synk): keep in_dim / M multiples of 128/16 upstream to skip this
        # extra memory-bound padding pass over the activations.
        x2 = jnp.zeros((m_pad, k_pad), compute_dtype).at[:m, :in_dim].set(x2)

    # Precompute the LoRA down-projection ONCE (tiny (m_pad, r_pad) f32 array)
    # instead of redoing it inside the kernel for every N tile.
    xa = jnp.dot(x2, a_t, preferred_element_type=jnp.float32)

    alpha_arr = jnp.asarray([alpha], dtype=jnp.float32)

    out_itemsize = jnp.dtype(x.dtype).itemsize
    in_itemsize = jnp.dtype(compute_dtype).itemsize
    # VMEM budget: double-buffered input/output tiles + f32 accumulator.
    vmem_est = (
        2 * tm_eff * tk_eff * in_itemsize          # x tiles
        + 2 * tk_eff * tn_eff * in_itemsize        # W_t tiles
        + 2 * tm_eff * r_pad * 4                   # xa tiles (f32)
        + 2 * r_pad * tn_eff * in_itemsize         # B_t tiles
        + 2 * tm_eff * tn_eff * out_itemsize       # output tiles
        + tm_eff * tn_eff * 4                      # f32 accumulator
    )
    vmem_limit = max(32 * 1024 * 1024, (vmem_est * 3) // 2)
    hw_vmem = _hw_vmem_bytes()
    if hw_vmem:
        vmem_limit = min(vmem_limit, (hw_vmem * 3) // 4)

    out = pl.pallas_call(
        _lora_linear_kernel,
        out_shape=jax.ShapeDtypeStruct((m_pad, n_pad), x.dtype),
        grid_spec=pltpu.PrefetchScalarGridSpec(
            num_scalar_prefetch=0,
            grid=(m_pad // tm_eff, n_pad // tn_eff, k_pad // tk_eff),
            in_specs=[
                pl.BlockSpec(memory_space=pltpu.MemorySpace.SMEM),         # alpha
                pl.BlockSpec((tm_eff, tk_eff), lambda i, j, k: (i, k)),    # x
                pl.BlockSpec((tk_eff, tn_eff), lambda i, j, k: (k, j)),    # W_t
                pl.BlockSpec((tm_eff, r_pad), lambda i, j, k: (i, 0)),     # xa
                pl.BlockSpec((r_pad, tn_eff), lambda i, j, k: (0, j)),     # B_t
            ],
            out_specs=pl.BlockSpec((tm_eff, tn_eff), lambda i, j, k: (i, j)),
            scratch_shapes=[
                pltpu.VMEM((tm_eff, tn_eff), jnp.float32),   # f32 accumulator
            ],
        ),
        compiler_params=pltpu.CompilerParams(
            dimension_semantics=("parallel", "parallel", "arbitrary"),
            vmem_limit_bytes=int(vmem_limit),
        ),
    )(alpha_arr, x2, w_t, xa, b_t)

    return out[:m, :out_dim].reshape(*lead, out_dim)


if __name__ == "__main__":
    # Small, module-consistent shapes.
    batch, seq = 2, 8
    in_dim, out_dim, rank = 32, 64, 4
    alpha = 2.0

    key = jax.random.PRNGKey(0)
    kx, kw, ka, kb = jax.random.split(key, 4)

    x = jax.random.normal(kx, (batch, seq, in_dim), dtype=jnp.float32)
    # nn.Linear stores weights as (out_features, in_features).
    w = jax.random.normal(kw, (out_dim, in_dim), dtype=jnp.float32) * 0.05
    a = jax.random.normal(ka, (rank, in_dim), dtype=jnp.float32) * 0.05
    b = jax.random.normal(kb, (out_dim, rank), dtype=jnp.float32) * 0.05

    # One-time weight preparation (transpose + lane-friendly padding + bf16
    # cast); this is a load-time step, not a per-call cost.
    w_t, a_t, b_t = prepare_lora_weights(w, a, b)

    y = lora_linear(x, w_t, a_t, b_t, alpha, out_dim)
    jax.block_until_ready(y)

    # Reference in plain JAX f32 (same math as the PyTorch module). Tolerance
    # accounts for bf16 MXU operands with f32 accumulation.
    ref = x @ w.T + alpha * ((x @ a.T) @ b.T)
    assert y.shape == (batch, seq, out_dim)
    err = float(jnp.max(jnp.abs(y.astype(jnp.float32) - ref)))
    assert jnp.allclose(y.astype(jnp.float32), ref, atol=2e-2, rtol=2e-2), err

    print("KERNEL_OK")
</pallas_src>

<mosaic_0001>
module attributes {stable_mosaic.version = 11 : i64} {
  func.func @_lora_linear_kernel(%arg0: i32, %arg1: i32, %arg2: i32, %arg3: memref<1xf32, #tpu.memory_space<smem>>, %arg4: memref<16x128xbf16, #tpu.memory_space<vmem>>, %arg5: memref<128x128xbf16, #tpu.memory_space<vmem>>, %arg6: memref<16x128xf32, #tpu.memory_space<vmem>>, %arg7: memref<128x128xbf16, #tpu.memory_space<vmem>>, %arg8: memref<16x128xf32, #tpu.memory_space<vmem>>, %arg9: memref<16x128xf32, #tpu.memory_space<vmem>>) attributes {dimension_semantics = [#tpu.dimension_semantics<parallel>, #tpu.dimension_semantics<parallel>, #tpu.dimension_semantics<arbitrary>], iteration_bounds = array<i64: 1, 1, 1>, scalar_prefetch = 0 : i64, scratch_operands = 1 : i64, tpu.core_type = #tpu.core_type<tc>, window_params = [{transform_indices = @transform_0, window_bounds = array<i64: 1>}, {transform_indices = @transform_1, window_bounds = array<i64: 16, 128>}, {transform_indices = @transform_2, window_bounds = array<i64: 128, 128>}, {transform_indices = @transform_3, window_bounds = array<i64: 16, 128>}, {transform_indices = @transform_4, window_bounds = array<i64: 128, 128>}, {transform_indices = @transform_5, window_bounds = array<i64: 16, 128>}]} {
    %c0_i32 = arith.constant 0 : i32
    %0 = arith.cmpi eq, %arg2, %c0_i32 : i32
    %1 = arith.extui %0 : i1 to i32
    %c0_i32_0 = arith.constant 0 : i32
    %2 = arith.cmpi ne, %1, %c0_i32_0 : i32
    scf.if %2 {
      %cst_10 = arith.constant 0.000000e+00 : f32
      %12 = vector.broadcast %cst_10 : f32 to vector<16x128xf32>
      %c0_11 = arith.constant 0 : index
      %c0_12 = arith.constant 0 : index
      %13 = vector.load %arg9[%c0_11, %c0_12] : memref<16x128xf32, #tpu.memory_space<vmem>>, vector<16x128xf32>
      tpu.vector_store %arg9[%c0_11, %c0_12], %12 {strides = array<i32>} : memref<16x128xf32, #tpu.memory_space<vmem>>, vector<16x128xf32>,
    } else {
    }
    %c0 = arith.constant 0 : index
    %c0_1 = arith.constant 0 : index
    %3 = vector.load %arg9[%c0, %c0_1] : memref<16x128xf32, #tpu.memory_space<vmem>>, vector<16x128xf32>
    %c0_2 = arith.constant 0 : index
    %c0_3 = arith.constant 0 : index
    %4 = vector.load %arg4[%c0_2, %c0_3] : memref<16x128xbf16, #tpu.memory_space<vmem>>, vector<16x128xbf16>
    %c0_4 = arith.constant 0 : index
    %c0_5 = arith.constant 0 : index
    %5 = vector.load %arg5[%c0_4, %c0_5] : memref<128x128xbf16, #tpu.memory_space<vmem>>, vector<128x128xbf16>
    %cst = arith.constant dense<0.000000e+00> : vector<16x128xf32>
    %6 = tpu.matmul %4, %5, %cst {dimension_numbers = #tpu.dot_dimension_numbers<[1], [0], [0], [1], [0, 0, 1, 1], [], []>} : vector<16x128xbf16>, vector<128x128xbf16>, vector<16x128xf32> -> vector<16x128xf32>
    %7 = arith.addf %3, %6 : vector<16x128xf32>
    %c0_6 = arith.constant 0 : index
    %c0_7 = arith.constant 0 : index
    %8 = vector.load %arg9[%c0_6, %c0_7] : memref<16x128xf32, #tpu.memory_space<vmem>>, vector<16x128xf32>
    tpu.vector_store %arg9[%c0_6, %c0_7], %7 {strides = array<i32>} : memref<16x128xf32, #tpu.memory_space<vmem>>, vector<16x128xf32>,
    %c0_i32_8 = arith.constant 0 : i32
    %9 = arith.cmpi eq, %arg2, %c0_i32_8 : i32
    %10 = arith.extui %9 : i1 to i32
    %c0_i32_9 = arith.constant 0 : i32
    %11 = arith.cmpi ne, %10, %c0_i32_9 : i32
    scf.if %11 {
      %c0_10 = arith.constant 0 : index
      %12 = memref.load %arg3[%c0_10] : memref<1xf32, #tpu.memory_space<smem>>
      %c0_11 = arith.constant 0 : index
      %c0_12 = arith.constant 0 : index
      %13 = vector.load %arg6[%c0_11, %c0_12] : memref<16x128xf32, #tpu.memory_space<vmem>>, vector<16x128xf32>
      %14 = vector.broadcast %12 : f32 to vector<16x128xf32>
      %15 = arith.mulf %14, %13 : vector<16x128xf32>
      %16 = arith.truncf %15 : vector<16x128xf32> to vector<16x128xbf16>
      %c0_13 = arith.constant 0 : index
      %c0_14 = arith.constant 0 : index
      %17 = vector.load %arg7[%c0_13, %c0_14] : memref<128x128xbf16, #tpu.memory_space<vmem>>, vector<128x128xbf16>
      %cst_15 = arith.constant dense<0.000000e+00> : vector<16x128xf32>
      %18 = tpu.matmul %16, %17, %cst_15 {dimension_numbers = #tpu.dot_dimension_numbers<[1], [0], [0], [1], [0, 0, 1, 1], [], []>} : vector<16x128xbf16>, vector<128x128xbf16>, vector<16x128xf32> -> vector<16x128xf32>
      %c0_16 = arith.constant 0 : index
      %c0_17 = arith.constant 0 : index
      %19 = vector.load %arg9[%c0_16, %c0_17] : memref<16x128xf32, #tpu.memory_space<vmem>>, vector<16x128xf32>
      %20 = arith.addf %19, %18 : vector<16x128xf32>
      %c0_18 = arith.constant 0 : index
      %c0_19 = arith.constant 0 : index
      %21 = vector.load %arg8[%c0_18, %c0_19] : memref<16x128xf32, #tpu.memory_space<vmem>>, vector<16x128xf32>
      tpu.vector_store %arg8[%c0_18, %c0_19], %20 {strides = array<i32>} : memref<16x128xf32, #tpu.memory_space<vmem>>, vector<16x128xf32>,
    } else {
    }
    return
  }
  func.func @transform_0(%arg0: i32, %arg1: i32, %arg2: i32) -> i32 {
    %c0_i32 = arith.constant 0 : i32
    %c0_i32_0 = arith.constant 0 : i32
    return %c0_i32 : i32
  }
  func.func @transform_1(%arg0: i32, %arg1: i32, %arg2: i32) -> (i32, i32) {
    %c0_i32 = arith.constant 0 : i32
    return %arg0, %arg2 : i32, i32
  }
  func.func @transform_2(%arg0: i32, %arg1: i32, %arg2: i32) -> (i32, i32) {
    %c0_i32 = arith.constant 0 : i32
    return %arg2, %arg1 : i32, i32
  }
  func.func @transform_3(%arg0: i32, %arg1: i32, %arg2: i32) -> (i32, i32) {
    %c0_i32 = arith.constant 0 : i32
    %c0_i32_0 = arith.constant 0 : i32
    return %arg0, %c0_i32 : i32, i32
  }
  func.func @transform_4(%arg0: i32, %arg1: i32, %arg2: i32) -> (i32, i32) {
    %c0_i32 = arith.constant 0 : i32
    %c0_i32_0 = arith.constant 0 : i32
    return %c0_i32, %arg1 : i32, i32
  }
  func.func @transform_5(%arg0: i32, %arg1: i32, %arg2: i32) -> (i32, i32) {
    %c0_i32 = arith.constant 0 : i32
    return %arg0, %arg1 : i32, i32
  }
}

</mosaic_0001>

<bundles_post_ra>
// kernel: tpu_custom_call.1
= control target key start
LH: loop header
LB: loop body
LE: loop exit
PB: predicated region body
PF: predicated region fallthrough
CT: control target
= control target key end

     0   :  { %11 = vsyncpa [#allocation5], 0  ;;  %s628_s0 = inlined_call_operand.<no memory space> [shape: f32[1], index: 0, kind: input, shape index: {}]   ;;  %s629_s1 = inlined_call_operand.hbm [shape: bf16[16,128], index: 1, kind: input, shape index: {}]   ;;  %s630_s2 = inlined_call_operand.hbm [shape: bf16[128,128], index: 2, kind: input, shape index: {}]   ;;  %s631_s3 = inlined_call_operand.hbm [shape: f32[16,128], index: 3, kind: input, shape index: {}]   ;;  %s632_s4 = inlined_call_operand.hbm [shape: bf16[128,128], index: 4, kind: input, shape index: {}]   ;;  %s633_s5 = inlined_call_operand.hbm [shape: f32[16,128], index: 5, kind: output, shape index: {}]  }
   0x1   :  { %12 = vsyncpa [#allocation8], 0 }
   0x2   :  { %13 = vsyncpa [#allocation11], 0 }
   0x3   :  { %14 = vsyncpa [#allocation6], 0  ;;  %s554_s18 = smov [#allocation7]   ;;  %s555_s20 = smov [#allocation4]  }
   0x4   :  { %s34_s19 = sshll.u32 %s554_s18, 4  ;;  %s22_s21 = sshll.u32 %s555_s20, 4  ;;  %s35_s19 = int_to_ptr.vmem [resolvable:$true] %s34_s19  ;;  %s23_s21 = int_to_ptr.vmem [resolvable:$true] %s22_s21 }
   0x5   :  { %s454_s22 = scalar_lea.vmem %s35_s19, 1024  ;;  %p459_p1 = scmp.lt.s32.totalorder %s35_s19, %s35_s19 }
   0x6   :  { %p455_p0 = scmp.ne.s32.totalorder %s35_s19, %s454_s22  ;;  %p460_p2 = scmp.lt.s32.totalorder %s454_s22, %s454_s22 }
   0x8   :  { %p461_p3 = por %p460_p2, %p459_p1 }
   0xa   :  { %p462_p4 = pnand %p461_p3, %p455_p0 }
   0xc   :  { %465 = shalt.err (!%p462_p4)
}
   0xd   :  { %s556_s23 = smov 64   ;;  %s557_s24 = smov 4  }
   0xe   :  { %40 = dma.hbm_to_vmem [thread:$0]  %s630_s2, 1024, %s35_s19, [#allocation8], %s556_s23, %s556_s23, %s557_s24  }
   0xf   :  { %s474_s27 = scalar_lea.vmem %s23_s21, 128  ;;  %p479_p6 = scmp.lt.s32.totalorder %s23_s21, %s23_s21 }
  0x10   :  { %p475_p5 = scmp.ne.s32.totalorder %s23_s21, %s474_s27  ;;  %p480_p7 = scmp.lt.s32.totalorder %s474_s27, %s474_s27 }
  0x12   :  { %p481_p8 = por %p480_p7, %p479_p6 }
  0x14   :  { %p482_p9 = pnand %p481_p8, %p475_p5 }
  0x16   :  { %485 = shalt.err (!%p482_p9)
}
  0x17   :  { %28 = dma.hbm_to_vmem [thread:$0]  %s629_s1, 128, %s23_s21, [#allocation5], %s556_s23, %s556_s23, %s557_s24  }
  0x18   :  { %s558_s30 = smov [#allocation9]  }
  0x19   :  { %s46_s6 = sshll.u32 %s558_s30, 4  ;;  %s47_s6 = int_to_ptr.vmem [resolvable:$true] %s46_s6 }
  0x1a   :  { %s494_s7 = scalar_lea.vmem %s47_s6, 256  ;;  %p499_p11 = scmp.lt.s32.totalorder %s47_s6, %s47_s6 }
  0x1b   :  { %p495_p10 = scmp.ne.s32.totalorder %s47_s6, %s494_s7  ;;  %p500_p12 = scmp.lt.s32.totalorder %s494_s7, %s494_s7 }
  0x1d   :  { %p501_p13 = por %p500_p12, %p499_p11 }
  0x1f   :  { %p502_p0 = pnand %p501_p13, %p495_p10 }
  0x21   :  { %505 = shalt.err (!%p502_p0)
}
  0x22   :  { %s559_s2 = smov 128   ;;  %s560_s8 = smov 8  }
  0x23   :  { %52 = dma.hbm_to_vmem [thread:$0]  %s631_s3, 256, %s47_s6, [#allocation8], %s559_s2, %s559_s2, %s560_s8  }
  0x24   :  { %s561_s1 = smov [#allocation10]  }
  0x25   :  { %s58_s11 = sshll.u32 %s561_s1, 4  ;;  %s59_s11 = int_to_ptr.vmem [resolvable:$true] %s58_s11 }
  0x26   :  { %s514_s12 = scalar_lea.vmem %s59_s11, 1024  ;;  %p519_p2 = scmp.lt.s32.totalorder %s59_s11, %s59_s11 }
  0x27   :  { %p515_p1 = scmp.ne.s32.totalorder %s59_s11, %s514_s12  ;;  %p520_p3 = scmp.lt.s32.totalorder %s514_s12, %s514_s12 }
  0x29   :  { %p521_p4 = por %p520_p3, %p519_p2 }
  0x2b   :  { %p522_p5 = pnand %p521_p4, %p515_p1 }
  0x2d   :  { %525 = shalt.err (!%p522_p5)
}
  0x2e   :  { %64 = dma.hbm_to_vmem [thread:$0]  %s632_s4, 1024, %s59_s11, [#allocation11], %s556_s23, %s556_s23, %s557_s24  }
  0x2f   :  { %546 = dma.done.wait [#allocation5], 128  }
  0x30   :  { %547 = vsyncadd [#allocation5], 4294967168 }
  0x31   :  { %548 = dma.done.wait [#allocation8], 1280  }
  0x32   :  { %549 = vsyncadd [#allocation8], 4294966016 }
  0x33   :  { %550 = dma.done.wait [#allocation11], 1024  }
  0x34   :  { %551 = vsyncadd [#allocation11], 4294966272  ;;  %v562_v0 = vmov 0.0   ;;  %vm563_vm0 = vmmov 0   ;;  %v429_v1 = vld [vmem:[#allocation7 + $0x38] sm:$0xff]   ;;  %v430_v2 = vld [vmem:[#allocation10 + $0x38] sm:$0xff]   ;;  %v209_v17 = vstv %s628_s0 }
  0x35   :  { %378 = vmatprep.subr.bf16.mxu0 %v562_v0  ;;  %398 = vmatprep.subr.bf16.mxu1 %v562_v0  ;;  %v431_v3 = vld [vmem:[#allocation7 + $0x30] sm:$0xff]   ;;  %v432_v4 = vld [vmem:[#allocation10 + $0x30] sm:$0xff]   ;;  %v433_v5 = vld [vmem:[#allocation7 + $0x28] sm:$0xff]   ;;  %s564_s0 = smov [#allocation12]  }
  0x36   :  { %394 = vmatprep.mubr.msk.bf16.mxu0 %vm563_vm0, %v562_v0  ;;  %414 = vmatprep.mubr.msk.bf16.mxu1 %vm563_vm0, %v562_v0  ;;  %v434_v6 = vld [vmem:[#allocation10 + $0x28] sm:$0xff]   ;;  %v435_v7 = vld [vmem:[#allocation7 + $0x20] sm:$0xff]   ;;  %v436_v8 = vld [vmem:[#allocation10 + $0x20] sm:$0xff]   ;;  %s329_s15 = sshll.u32 %s564_s0, 4  ;;  %s330_s15 = int_to_ptr.vmem [resolvable:$true] %s329_s15 }
  0x37   :  { %379 = vmatpush3.bf16.msra.mxu0 %v429_v1  ;;  %399 = vmatpush3.bf16.msra.mxu1 %v430_v2  ;;  %v437_v9 = vld [vmem:[#allocation7 + $0x18] sm:$0xff]   ;;  %v438_v10 = vld [vmem:[#allocation10 + $0x18] sm:$0xff]   ;;  %v439_v11 = vld [vmem:[#allocation7 + $0x10] sm:$0xff]   ;;  %s526_s16 = scalar_lea.vmem %s330_s15, 256  ;;  %p531_p7 = scmp.lt.s32.totalorder %s330_s15, %s330_s15 }
  0x38   :  { %380 = vmatprep.subr.bf16.mxu0 %v562_v0  ;;  %400 = vmatprep.subr.bf16.mxu1 %v562_v0  ;;  %v440_v12 = vld [vmem:[#allocation10 + $0x10] sm:$0xff]   ;;  %v441_v13 = vld [vmem:[#allocation7 + $0x8] sm:$0xff]   ;;  %v442_v14 = vld [vmem:[#allocation10 + $0x8] sm:$0xff]   ;;  %p527_p6 = scmp.ne.s32.totalorder %s330_s15, %s526_s16  ;;  %p532_p8 = scmp.lt.s32.totalorder %s526_s16, %s526_s16 }
  0x39   :  { %v207_v15 = vld [vmem:[#allocation9] sm:$0xff]  ;;  %v208_v16 = vld [vmem:[#allocation9 + $0x8] sm:$0xff]  ;;  %v444_v21 = vld [vmem:[#allocation10] sm:$0xff]  }
  0x3a   :  { %v443_v18 = vld [vmem:[#allocation7] sm:$0xff]   ;;  %v210_v19 = vmul.f32 %v209_v17, %v207_v15  ;;  %v211_v20 = vmul.f32 %v209_v17, %v208_v16  ;;  %v445_v22 = vld [vmem:[#allocation4] sm:$0xff]   ;;  %p533_p9 = por %p532_p8, %p531_p7 }
  0x3b   :  { %381 = vmatpush3.bf16.msra.mxu0 %v431_v3  ;;  %401 = vmatpush3.bf16.msra.mxu1 %v432_v4 }
  0x3c   :  { %382 = vmatprep.subr.bf16.mxu0 %v562_v0  ;;  %402 = vmatprep.subr.bf16.mxu1 %v562_v0  ;;  %v212_v23 = vpack.c.bf16 %v211_v20, %v210_v19  ;;  %p534_p10 = pnand %p533_p9, %p527_p6 }
  0x3f   :  { %383 = vmatpush3.bf16.msra.mxu0 %v433_v5  ;;  %403 = vmatpush3.bf16.msra.mxu1 %v434_v6 }
  0x40   :  { %384 = vmatprep.subr.bf16.mxu0 %v562_v0  ;;  %404 = vmatprep.subr.bf16.mxu1 %v562_v0 }
  0x43   :  { %385 = vmatpush3.bf16.msra.mxu0 %v435_v7  ;;  %405 = vmatpush3.bf16.msra.mxu1 %v436_v8 }
  0x44   :  { %386 = vmatprep.subr.bf16.mxu0 %v562_v0  ;;  %406 = vmatprep.subr.bf16.mxu1 %v562_v0 }
  0x47   :  { %387 = vmatpush3.bf16.msra.mxu0 %v437_v9  ;;  %407 = vmatpush3.bf16.msra.mxu1 %v438_v10 }
  0x48   :  { %388 = vmatprep.subr.bf16.mxu0 %v562_v0  ;;  %408 = vmatprep.subr.bf16.mxu1 %v562_v0 }
  0x4b   :  { %389 = vmatpush3.bf16.msra.mxu0 %v439_v11  ;;  %409 = vmatpush3.bf16.msra.mxu1 %v440_v12 }
  0x4c   :  { %390 = vmatprep.subr.bf16.mxu0 %v562_v0  ;;  %410 = vmatprep.subr.bf16.mxu1 %v562_v0 }
  0x4f   :  { %391 = vmatpush3.bf16.msra.mxu0 %v441_v13  ;;  %411 = vmatpush3.bf16.msra.mxu1 %v442_v14 }
  0x50   :  { %392 = vmatprep.subr.bf16.mxu0 %v562_v0  ;;  %412 = vmatprep.subr.bf16.mxu1 %v562_v0 }
  0x53   :  { %393 = vmatpush3.bf16.msra.mxu0 %v443_v18  ;;  %413 = vmatpush3.bf16.msra.mxu1 %v444_v21 }
  0x56   :  { %395 = vmatmul.mubr.bf16.vlgmr.msra.gmra.mxu0 %v445_v22  ;;  %415 = vmatmul.mubr.bf16.vlgmr.msra.gmra.mxu1 %v212_v23 }
 0x116   :  { %v192_v24 = vpop.f32.mrf.mxu0  ;;  %v311_v25 = vpop.f32.mrf.mxu1 }
 0x117   :  { %v320_v26 = vadd.f32 %v311_v25, %v192_v24 }
 0x118   :  { %v396_v27 = vpop.f32.mrf.mxu0  ;;  %v416_v28 = vpop.f32.mrf.mxu1 }
 0x119   :  { %322 = vst [vmem:[#allocation12] sm:$0xff] %v320_v26 }
 0x11a   :  { %v195_v29 = vpop.f32.mrf.mxu0  ;;  %v314_v30 = vpop.f32.mrf.mxu1 }
 0x11b   :  { %v321_v31 = vadd.f32 %v314_v30, %v195_v29 }
 0x11c   :  { %v397_v32 = vpop.f32.mrf.mxu0  ;;  %v417_v33 = vpop.f32.mrf.mxu1 }
 0x11d   :  { %323 = vst [vmem:[#allocation12 + $0x8] sm:$0xff] %v321_v31 }
 0x11e   :  { %537 = shalt.err (!%p534_p10)
}
 0x11f   :  { %335 = dma.vmem_to_hbm [thread:$0]  %s330_s15, 256, %s633_s5, [#allocation6], %s559_s2, %s559_s2, %s560_s8  }
 0x120   :  { %552 = dma.done.wait [#allocation6], 256  }
 0x121   :  { %553 = vsyncadd [#allocation6], 4294967040 }
 0x122   :  { %339 = vsyncpa [#allocation5], 1 }
 0x123   :  { %340 = vsyncpa [#allocation8], 1 }
 0x124   :  { %341 = vsyncpa [#allocation11], 1 }
 0x125   :  { %342 = vsyncpa [#allocation6], 1 }

</bundles_post_ra>
